<compile_context>
chip_gen: v5e
topology: v5e:2x2
jax: 0.10.0
libtpu: 0.0.40
codegen_flags: <defaults>
</compile_context>

<pallas_src>
import functools

import jax
import jax.numpy as jnp
from jax.experimental import pallas as pl
from jax.experimental.pallas import tpu as pltpu

# Synthetic stand-ins for utils.* constants (deterministic, small).
CNT_CATS = 4
TOP_K_PROP_NAMES = 8
IN_DIM = CNT_CATS * TOP_K_PROP_NAMES      # 32
AGG_HIDDEN_SIZE = 32                      # hidden width
BATCH = 8


def _round_up(n, m):
    return ((n + m - 1) // m) * m


def mlp_kernel(x_ref, w1_ref, b1_ref, w2_ref, b2_ref, o_ref):
    # x_ref : (TB, D)  batch on sublanes, features on lanes (no wrapper transpose)
    # w1_ref: (D, H)   resident across the grid
    # b1_ref: (1, H)
    # w2_ref: (1, H)   W2 as a row vector
    # b2_ref: (1, 1)   SMEM scalar
    # o_ref : (TB, 1)
    h = jnp.dot(x_ref[...], w1_ref[...],
                preferred_element_type=jnp.float32)           # (TB, H)  MXU, single pass
    h = jnp.maximum(h + b1_ref[...], 0.0)                     # bias (sublane-bcast) + ReLU
    # Second linear (H -> 1) as VPU multiply + XLU cross-lane reduce
    # (avoids a nearly-empty 1-column MXU matmul).
    z = jnp.sum(h * w2_ref[...], axis=-1, keepdims=True)      # (TB, 1)
    z = z + b2_ref[0, 0]                                      # scalar bias from SMEM
    # sigmoid(z) = 1 / (1 + exp(-z)); exp + approx reciprocal both land on EUP.
    o_ref[...] = pl.reciprocal(1.0 + jnp.exp(-z), approx=True).astype(o_ref.dtype)


@functools.partial(jax.jit, static_argnames=("block_b",))
def mlp_forward(x, w1, b1, w2, b2, *, block_b=16384):
    """x:(B,D), w1:(D,H), b1:(H,), w2:(H,1), b2:() -> (B,1) float32."""
    B, D = x.shape
    H = w1.shape[1]

    # Batch tile on sublanes: multiple of 8 when multi-step; equal to B when
    # the whole batch fits in one step (full-dim block is always legal).
    # 16K rows/step -> ~2 MiB of x per DMA: big enough to amortize the ~0.35 us
    # per-grid-step overhead, small enough for v5e's 16 MiB scoped VMEM and
    # v7x's 64 MiB physical VMEM without touching vmem_limit_bytes.
    block_b = max(8, _round_up(block_b, 8))
    if B <= block_b:
        tile_b = B
        num_tiles = 1
    else:
        tile_b = block_b
        num_tiles = pl.cdiv(B, tile_b)   # partial last block: OOB writes discarded

    # No jnp.pad / no transpose of x: removing the extra HBM read+write of x is
    # the dominant win for this memory-bound kernel.
    b1r = b1.reshape(1, H)                               # (1, H)
    w2r = w2.reshape(1, H)                               # (1, H)
    b2s = jnp.asarray(b2, jnp.float32).reshape(1, 1)     # scalar -> SMEM

    cost = pl.CostEstimate(
        flops=2 * B * D * H + 2 * B * H,
        transcendentals=B,
        bytes_accessed=4 * (B * D + B + D * H + 2 * H + 1),
    )

    out = pl.pallas_call(
        mlp_kernel,
        out_shape=jax.ShapeDtypeStruct((B, 1), jnp.float32),
        grid=(num_tiles,),
        in_specs=[
            pl.BlockSpec((tile_b, D), lambda i: (i, 0)),        # x tile (sublane-tiled)
            pl.BlockSpec((D, H), lambda i: (0, 0)),             # W1, fetched once
            pl.BlockSpec((1, H), lambda i: (0, 0)),             # b1
            pl.BlockSpec((1, H), lambda i: (0, 0)),             # w2 row
            pl.BlockSpec(memory_space=pltpu.MemorySpace.SMEM),  # b2 scalar
        ],
        out_specs=pl.BlockSpec((tile_b, 1), lambda i: (i, 0)),
        compiler_params=pltpu.CompilerParams(
            # Batch tiles are independent; "parallel" lets multi-TC parts split
            # the grid.  TODO(synk): try pltpu.CORE_PARALLEL on v7x once batch
            # sizes guarantee >=2 grid steps.
            dimension_semantics=("parallel",)),
        cost_estimate=cost,
    )(x, w1, b1r, w2r, b2s)

    return out


def init_params(key):
    # Deterministic init mimicking torch.nn.Linear default (+/- 1/sqrt(fan_in)).
    k1, k2, k3, k4 = jax.random.split(key, 4)
    bound1 = 1.0 / jnp.sqrt(IN_DIM)
    bound2 = 1.0 / jnp.sqrt(AGG_HIDDEN_SIZE)
    w1 = jax.random.uniform(k1, (IN_DIM, AGG_HIDDEN_SIZE), jnp.float32,
                            minval=-bound1, maxval=bound1)
    b1 = jax.random.uniform(k2, (AGG_HIDDEN_SIZE,), jnp.float32,
                            minval=-bound1, maxval=bound1)
    w2 = jax.random.uniform(k3, (AGG_HIDDEN_SIZE, 1), jnp.float32,
                            minval=-bound2, maxval=bound2)
    b2 = jax.random.uniform(k4, (), jnp.float32,
                            minval=-bound2, maxval=bound2)
    return w1, b1, w2, b2


def reference(x, w1, b1, w2, b2):
    return jax.nn.sigmoid(jnp.maximum(x @ w1 + b1[None, :], 0.0) @ w2 + b2)


if __name__ == "__main__":
    key = jax.random.PRNGKey(0)
    kx, kp, kx2, kx3 = jax.random.split(key, 4)
    w1, b1, w2, b2 = init_params(kp)

    # Small demo batch (single grid step, block == full batch dim).
    x = jax.random.normal(kx, (BATCH, IN_DIM), jnp.float32)
    out = mlp_forward(x, w1, b1, w2, b2)
    jax.block_until_ready(out)
    ref = reference(x, w1, b1, w2, b2)
    assert out.shape == (BATCH, 1)
    assert jnp.allclose(out, ref, atol=2e-3, rtol=2e-3), \
        float(jnp.max(jnp.abs(out - ref)))

    # Non-multiple batch with a multi-step parallel grid and a partial last
    # block (exercises cdiv grid + discarded OOB rows, no padding anywhere).
    x2 = jax.random.normal(kx2, (300, IN_DIM), jnp.float32)
    out2 = mlp_forward(x2, w1, b1, w2, b2, block_b=128)
    jax.block_until_ready(out2)
    ref2 = reference(x2, w1, b1, w2, b2)
    assert out2.shape == (300, 1)
    assert jnp.allclose(out2, ref2, atol=2e-3, rtol=2e-3), \
        float(jnp.max(jnp.abs(out2 - ref2)))

    # Odd batch that fits in one default-sized tile (full-dim block, B % 8 != 0).
    x3 = jax.random.normal(kx3, (1027, IN_DIM), jnp.float32)
    out3 = mlp_forward(x3, w1, b1, w2, b2)
    jax.block_until_ready(out3)
    ref3 = reference(x3, w1, b1, w2, b2)
    assert out3.shape == (1027, 1)
    assert jnp.allclose(out3, ref3, atol=2e-3, rtol=2e-3), \
        float(jnp.max(jnp.abs(out3 - ref3)))

    print("KERNEL_OK")
</pallas_src>

<mosaic_0001>
module attributes {stable_mosaic.version = 11 : i64} {
  func.func @mlp_kernel(%arg0: i32, %arg1: memref<8x32xf32, #tpu.memory_space<vmem>>, %arg2: memref<32x32xf32, #tpu.memory_space<vmem>>, %arg3: memref<1x32xf32, #tpu.memory_space<vmem>>, %arg4: memref<1x32xf32, #tpu.memory_space<vmem>>, %arg5: memref<1x1xf32, #tpu.memory_space<smem>>, %arg6: memref<8x1xf32, #tpu.memory_space<vmem>>) attributes {dimension_semantics = [#tpu.dimension_semantics<parallel>], iteration_bounds = array<i64: 1>, scalar_prefetch = 0 : i64, scratch_operands = 0 : i64, tpu.core_type = #tpu.core_type<tc>, window_params = [{transform_indices = @transform_0, window_bounds = array<i64: 8, 32>}, {pipeline_mode = #tpu.pipeline_mode<synchronous>, transform_indices = @transform_1, window_bounds = array<i64: 32, 32>}, {pipeline_mode = #tpu.pipeline_mode<synchronous>, transform_indices = @transform_2, window_bounds = array<i64: 1, 32>}, {pipeline_mode = #tpu.pipeline_mode<synchronous>, transform_indices = @transform_3, window_bounds = array<i64: 1, 32>}, {transform_indices = @transform_4, window_bounds = array<i64: 1, 1>}, {transform_indices = @transform_5, window_bounds = array<i64: 8, 1>}]} {
    %c0 = arith.constant 0 : index
    %c0_0 = arith.constant 0 : index
    %0 = vector.load %arg1[%c0, %c0_0] : memref<8x32xf32, #tpu.memory_space<vmem>>, vector<8x32xf32>
    %c0_1 = arith.constant 0 : index
    %c0_2 = arith.constant 0 : index
    %1 = vector.load %arg2[%c0_1, %c0_2] : memref<32x32xf32, #tpu.memory_space<vmem>>, vector<32x32xf32>
    %cst = arith.constant dense<0.000000e+00> : vector<8x32xf32>
    %2 = tpu.matmul %0, %1, %cst {dimension_numbers = #tpu.dot_dimension_numbers<[1], [0], [0], [1], [0, 0, 1, 1], [], []>} : vector<8x32xf32>, vector<32x32xf32>, vector<8x32xf32> -> vector<8x32xf32>
    %c0_3 = arith.constant 0 : index
    %c0_4 = arith.constant 0 : index
    %3 = vector.load %arg3[%c0_3, %c0_4] : memref<1x32xf32, #tpu.memory_space<vmem>>, vector<1x32xf32>
    %4 = vector.broadcast %3 : vector<1x32xf32> to vector<8x32xf32>
    %5 = arith.addf %2, %4 : vector<8x32xf32>
    %cst_5 = arith.constant 0.000000e+00 : f32
    %6 = vector.broadcast %cst_5 : f32 to vector<8x32xf32>
    %7 = arith.maximumf %5, %6 : vector<8x32xf32>
    %c0_6 = arith.constant 0 : index
    %c0_7 = arith.constant 0 : index
    %8 = vector.load %arg4[%c0_6, %c0_7] : memref<1x32xf32, #tpu.memory_space<vmem>>, vector<1x32xf32>
    %9 = vector.broadcast %8 : vector<1x32xf32> to vector<8x32xf32>
    %10 = arith.mulf %7, %9 : vector<8x32xf32>
    %cst_8 = arith.constant dense<0.000000e+00> : vector<8xf32>
    %11 = vector.multi_reduction <add>, %10, %cst_8 [1] : vector<8x32xf32> to vector<8xf32>
    %12 = vector.shape_cast %11 : vector<8xf32> to vector<8x1xf32>
    %c0_9 = arith.constant 0 : index
    %c0_10 = arith.constant 0 : index
    %13 = memref.load %arg5[%c0_9, %c0_10] : memref<1x1xf32, #tpu.memory_space<smem>>
    %14 = vector.broadcast %13 : f32 to vector<8x1xf32>
    %15 = arith.addf %12, %14 : vector<8x1xf32>
    %cst_11 = arith.constant 0.000000e+00 : f32
    %16 = vector.broadcast %cst_11 : f32 to vector<8x1xf32>
    %17 = arith.subf %16, %15 : vector<8x1xf32>
    %18 = math.exp %17 : vector<8x1xf32>
    %cst_12 = arith.constant 1.000000e+00 : f32
    %19 = vector.broadcast %cst_12 : f32 to vector<8x1xf32>
    %20 = arith.addf %19, %18 : vector<8x1xf32>
    %21 = tpu.reciprocal %20 {approx = true} : vector<8x1xf32> -> vector<8x1xf32>
    %c0_13 = arith.constant 0 : index
    %c0_14 = arith.constant 0 : index
    %22 = vector.load %arg6[%c0_13, %c0_14] : memref<8x1xf32, #tpu.memory_space<vmem>>, vector<8x1xf32>
    tpu.vector_store %arg6[%c0_13, %c0_14], %21 {strides = array<i32>} : memref<8x1xf32, #tpu.memory_space<vmem>>, vector<8x1xf32>,
    return
  }
  func.func @transform_0(%arg0: i32) -> (i32, i32) {
    %c0_i32 = arith.constant 0 : i32
    %c0_i32_0 = arith.constant 0 : i32
    return %arg0, %c0_i32 : i32, i32
  }
  func.func @transform_1(%arg0: i32) -> (i32, i32) {
    %c0_i32 = arith.constant 0 : i32
    %c0_i32_0 = arith.constant 0 : i32
    %c0_i32_1 = arith.constant 0 : i32
    return %c0_i32, %c0_i32_0 : i32, i32
  }
  func.func @transform_2(%arg0: i32) -> (i32, i32) {
    %c0_i32 = arith.constant 0 : i32
    %c0_i32_0 = arith.constant 0 : i32
    %c0_i32_1 = arith.constant 0 : i32
    return %c0_i32, %c0_i32_0 : i32, i32
  }
  func.func @transform_3(%arg0: i32) -> (i32, i32) {
    %c0_i32 = arith.constant 0 : i32
    %c0_i32_0 = arith.constant 0 : i32
    %c0_i32_1 = arith.constant 0 : i32
    return %c0_i32, %c0_i32_0 : i32, i32
  }
  func.func @transform_4(%arg0: i32) -> (i32, i32) {
    %c0_i32 = arith.constant 0 : i32
    %c0_i32_0 = arith.constant 0 : i32
    %c0_i32_1 = arith.constant 0 : i32
    return %c0_i32, %c0_i32_0 : i32, i32
  }
  func.func @transform_5(%arg0: i32) -> (i32, i32) {
    %c0_i32 = arith.constant 0 : i32
    %c0_i32_0 = arith.constant 0 : i32
    return %arg0, %c0_i32 : i32, i32
  }
}

</mosaic_0001>

<bundles_post_ra>
// kernel: mlp_forward.1
= control target key start
LH: loop header
LB: loop body
LE: loop exit
PB: predicated region body
PF: predicated region fallthrough
CT: control target
= control target key end

     0   :  { %11 = vsyncpa [#allocation4], 0  ;;  %s224_s0 = inlined_call_operand.hbm [shape: f32[8,32], index: 0, kind: input, shape index: {}]   ;;  %s225_s1 = inlined_call_operand.hbm [shape: f32[32,32], index: 1, kind: input, shape index: {}]   ;;  %s226_s2 = inlined_call_operand.vmem [shape: f32[1,32], index: 2, kind: input, shape index: {}]   ;;  %s227_s3 = inlined_call_operand.vmem [shape: f32[1,32], index: 3, kind: input, shape index: {}]   ;;  %s228_s4 = inlined_call_operand.<no memory space> [shape: f32[1,1], index: 4, kind: input, shape index: {}]   ;;  %s229_s5 = inlined_call_operand.vmem [shape: f32[8,1], index: 5, kind: output, shape index: {}]  }
   0x1   :  { %s18_s20 = sshll.u32 %s224_s0, 4  ;;  %s19_s20 = int_to_ptr.hbm [resolvable:$true] %s18_s20 }
   0x2   :  { %12 = vsyncpa [#allocation6], 0  ;;  %s172_s21 = smov [#allocation3]   ;;  %s28_s25 = sshll.u32 %s225_s1, 4  ;;  %s29_s25 = int_to_ptr.hbm [resolvable:$true] %s28_s25 }
   0x3   :  { %s20_s22 = sshll.u32 %s172_s21, 4  ;;  %s173_s26 = smov [#allocation5]   ;;  %s21_s22 = int_to_ptr.vmem [resolvable:$true] %s20_s22 }
   0x4   :  { %23 = dma.hbm_to_vmem [thread:$0]  %s19_s20, 128, %s21_s22, [#allocation4]  }
   0x5   :  { %s30_s27 = sshll.u32 %s173_s26, 4  ;;  %s174_s28 = smov 128   ;;  %s31_s27 = int_to_ptr.vmem [resolvable:$true] %s30_s27 }
   0x6   :  { %s175_s29 = smov 8  }
   0x7   :  { %36 = dma.hbm_to_vmem [thread:$0]  %s29_s25, 512, %s31_s27, [#allocation6], %s174_s28, %s174_s28, %s175_s29  }
   0x8   :  { %168 = dma.done.wait [#allocation4], 128  }
   0x9   :  { %169 = vsyncadd [#allocation4], 4294967168 }
   0xa   :  { %170 = dma.done.wait [#allocation6], 512  }
   0xb   :  { %171 = vsyncadd [#allocation6], 4294966784  ;;  %v55_v0 = vld [vmem:[#allocation5 + $0x18] sm:$0xff]  ;;  %v54_v1 = vld [vmem:[#allocation5 + $0x10] sm:$0xff]  ;;  %vm60_vm0 = vcmask 261120   ;;  %v94_v12 = vstv %s228_s4  ;;  %vm101_vm1 = vcmask 7168  }
   0xc   :  { %76 = vmatpush.msra.mxu0 %v55_v0  ;;  %v53_v2 = vld [vmem:[#allocation5 + $0x8] sm:$0xff]  ;;  %v52_v3 = vld [vmem:[#allocation5] sm:$0xff]  ;;  %v51_v4 = vld [vmem:[#allocation3] sm:$0xff] }
   0xd   :  { %v114_v5 = vld [vmem:[%s226_s2] ss:$0 sm:$0xff] }
   0xe   :  { %77 = vmatpush.msra.mxu0 %v54_v1  ;;  %v115_v8 = vld [vmem:[%s227_s3] ss:$0 sm:$0xff] }
  0x10   :  { %78 = vmatpush.msra.mxu0 %v53_v2 }
  0x12   :  { %79 = vmatpush.msra.mxu0 %v52_v3 }
  0x13   :  { %109 = vmatmul.msk.f32.vlgmr.msra.gmra.mxu0 %vm60_vm0, %v51_v4 }
  0x90   :  { %v81_v6 = vpop.f32.mrf.mxu0 }
  0x91   :  { %v82_v7 = vadd.f32 %v114_v5, %v81_v6 }
  0x93   :  { %v84_v9 = vmax.f32 %v82_v7, 0.0 }
  0x95   :  { %v89_v10 = vmul.f32 %v115_v8, %v84_v9 }
  0x97   :  { %v90_v11 = vsel %vm60_vm0, %v89_v10, 0.0 }
  0x98   :  { %91 = vadd.xlane.f32.xlu0 %v90_v11 }
 0x10b   :  { %v92_v13 = vpop.xlane.xlu0 %91 }
 0x10c   :  { %v95_v14 = vadd.f32 %v94_v12, %v92_v13 }
 0x10e   :  { %v96_v15 = vsub.f32 0.0, %v95_v14 }
 0x110   :  { %v97_v16 = vmul.f32 1.442695, %v96_v15 }
 0x112   :  { %116 = vpow2.f32 %v97_v16 }
 0x118   :  { %v117_v17 = vpop.eup %116 }
 0x119   :  { %v99_v18 = vadd.f32 1.0, %v117_v17 }
 0x11b   :  { %118 = vrcp.f32 %v99_v18 }
 0x121   :  { %v119_v19 = vpop.eup %118 }
 0x122   :  { %102 = vst.msk [vmem:[%s229_s5] sm:$0xff] %vm101_vm1, %v119_v19 }
 0x123   :  { %107 = vsyncpa [#allocation4], 1 }
 0x124   :  { %108 = vsyncpa [#allocation6], 1 }

</bundles_post_ra>
